<compile_context>
chip_gen: v5e
topology: v5e:2x2
jax: 0.10.0
libtpu: 0.0.40
codegen_flags: <defaults>
</compile_context>

<pallas_src>
import jax
import jax.numpy as jnp
from jax.experimental import pallas as pl
from jax.experimental.pallas import tpu as pltpu


# ---------------------------------------------------------------------------
# Kernel
# ---------------------------------------------------------------------------
def _make_ple_kernel(n_sp, n_sh, hidden, e_out, compute_dtype):
    """Fused PLE_Output_Layer kernel body for one batch tile."""
    hcols = n_sp * hidden  # expert-hidden columns inside the fused fc1(+gate) output

    def _mm(a):
        # Cast matmul LHS to the (pre-cast) weight dtype only when a bf16 MXU
        # path is requested; accumulation is always f32.
        return a if compute_dtype is None else a.astype(compute_dtype)

    def _softmax(z):
        z = z - jnp.max(z, axis=-1, keepdims=True)
        e = jnp.exp(z)
        return e / jnp.sum(e, axis=-1, keepdims=True)

    def kernel(x_ref,
               wa1, ba1, wa2, ba2, was, bas,     # fused fc1 (+gate) per input path
               wb1, bb1, wb2, bb2, wbs, bbs,     # block-diagonal fused fc2 per group
               twa, tba, twb, tbb,               # block-diagonal fused towers
               out_ref):
        # ---- task-1 path: ONE wide matmul = all task-1 expert fc1's + gate dnn1
        a1 = jnp.dot(_mm(x_ref[0]), wa1[...],
                     preferred_element_type=jnp.float32) + ba1[...]
        h1 = jnp.maximum(a1[:, :hcols], 0.0)          # ReLU; Dropout(0.3)=id (eval)
        sel1 = _softmax(a1[:, hcols:])                # gate softmax [TB, n_sp+n_sh]
        eo1 = jnp.dot(_mm(h1), wb1[...],
                      preferred_element_type=jnp.float32) + bb1[...]   # [TB, n_sp*O]

        # ---- task-2 path
        a2 = jnp.dot(_mm(x_ref[1]), wa2[...],
                     preferred_element_type=jnp.float32) + ba2[...]
        h2 = jnp.maximum(a2[:, :hcols], 0.0)
        sel2 = _softmax(a2[:, hcols:])
        eo2 = jnp.dot(_mm(h2), wb2[...],
                      preferred_element_type=jnp.float32) + bb2[...]

        # ---- shared experts: computed once, reused by both gates
        hs = jnp.maximum(
            jnp.dot(_mm(x_ref[2]), was[...],
                    preferred_element_type=jnp.float32) + bas[...], 0.0)
        eos = jnp.dot(_mm(hs), wbs[...],
                      preferred_element_type=jnp.float32) + bbs[...]   # [TB, n_sh*O]

        # ---- torch.einsum('abc,ba->bc'): accumulate the mix expert-by-expert
        # (expert order = [task-specific..., shared...]); keeps live ranges small.
        gate1 = sel1[:, 0:1] * eo1[:, 0:e_out]
        gate2 = sel2[:, 0:1] * eo2[:, 0:e_out]
        for e in range(1, n_sp):
            gate1 = gate1 + sel1[:, e:e + 1] * eo1[:, e * e_out:(e + 1) * e_out]
            gate2 = gate2 + sel2[:, e:e + 1] * eo2[:, e * e_out:(e + 1) * e_out]
        for e in range(n_sh):
            g = n_sp + e
            so = eos[:, e * e_out:(e + 1) * e_out]
            gate1 = gate1 + sel1[:, g:g + 1] * so
            gate2 = gate2 + sel2[:, g:g + 1] * so

        # ---- both towers fused via block-diagonal weights -> merged [TB, 2] out
        g12 = jnp.concatenate([gate1, gate2], axis=-1)           # [TB, 2*O]
        th = jnp.maximum(
            jnp.dot(_mm(g12), twa[...],
                    preferred_element_type=jnp.float32) + tba[...], 0.0)   # Dropout(0.4)=id
        out = jnp.dot(_mm(th), twb[...],
                      preferred_element_type=jnp.float32) + tbb[...]       # [TB, 2]
        out_ref[...] = out.astype(out_ref.dtype)

    return kernel


# ---------------------------------------------------------------------------
# Wrapper-side weight fusion helpers
# ---------------------------------------------------------------------------
def _round_up(x, m):
    return ((x + m - 1) // m) * m


def _fuse_fc1(w1s, b1s, gate_w=None, gate_b=None):
    """Stacked fc1 [n, F, H] -> [F, n*H]; optionally append gate columns."""
    n, f, h = w1s.shape
    w = jnp.transpose(w1s, (1, 0, 2)).reshape(f, n * h)
    b = jnp.transpose(b1s, (1, 0, 2)).reshape(1, n * h)
    if gate_w is not None:
        w = jnp.concatenate([w, gate_w], axis=1)
        b = jnp.concatenate([b, gate_b], axis=1)
    return w, b


def _fuse_fc2_block_diag(w2s, b2s):
    """Stacked fc2 [n, H, O] -> block-diagonal [n*H, n*O] (zeros off-diagonal)."""
    n, h, o = w2s.shape
    w = jnp.zeros((n * h, n * o), w2s.dtype)
    for e in range(n):
        w = w.at[e * h:(e + 1) * h, e * o:(e + 1) * o].set(w2s[e])
    b = jnp.transpose(b2s, (1, 0, 2)).reshape(1, n * o)
    return w, b


def _block_diag2(wa, wb):
    ra, ca = wa.shape
    rb, cb = wb.shape
    out = jnp.zeros((ra + rb, ca + cb), wa.dtype)
    out = out.at[:ra, :ca].set(wa)
    out = out.at[ra:, ca:].set(wb)
    return out


# ---------------------------------------------------------------------------
# Wrapper
# ---------------------------------------------------------------------------
def ple_output_forward(x1, x2, x_share, params, *, block_b=1024,
                       min_grid_steps=1, compute_dtype=None):
    """Eval-mode forward of PLE_Output_Layer as one fused Pallas kernel.

    block_b:        max batch-tile size (sweep 1024-4096 on single-TC v5e/v6e).
    min_grid_steps: set >=2 on v7x (2 TensorCores) so 'parallel' has work to shard.
    compute_dtype:  e.g. jnp.bfloat16 for the bf16 MXU path (f32 accumulate);
                    None keeps full-f32 operands.
    """
    B, F = x1.shape
    n_sp, _, hidden = params["e1_w1"].shape
    n_sh = params["es_w1"].shape[0]
    e_out = params["e1_w2"].shape[-1]
    t_hidden = params["t1_w1"].shape[-1]
    n_gate = n_sp + n_sh

    # ---- wrapper-side weight fusion (one-time prep; constant-folds under jit) ----
    wa1, ba1 = _fuse_fc1(params["e1_w1"], params["e1_b1"], params["g1_w"], params["g1_b"])
    wa2, ba2 = _fuse_fc1(params["e2_w1"], params["e2_b1"], params["g2_w"], params["g2_b"])
    was, bas = _fuse_fc1(params["es_w1"], params["es_b1"])
    wb1, bb1 = _fuse_fc2_block_diag(params["e1_w2"], params["e1_b2"])
    wb2, bb2 = _fuse_fc2_block_diag(params["e2_w2"], params["e2_b2"])
    wbs, bbs = _fuse_fc2_block_diag(params["es_w2"], params["es_b2"])
    twa = _block_diag2(params["t1_w1"], params["t2_w1"])
    tba = jnp.concatenate([params["t1_b1"], params["t2_b1"]], axis=1)
    twb = _block_diag2(params["t1_w2"], params["t2_w2"])
    tbb = jnp.concatenate([params["t1_b2"], params["t2_b2"]], axis=1)

    # Single stacked activation input -> one DMA per batch tile.
    x = jnp.stack([x1, x2, x_share], axis=0)                # [3, B, F]

    mats = dict(wa1=wa1, wa2=wa2, was=was, wb1=wb1, wb2=wb2, wbs=wbs, twa=twa, twb=twb)
    if compute_dtype is not None:
        # Pre-cast matmul operands once (halves weight/x DMA bytes & VMEM);
        # biases stay f32 and are added to the f32 accumulators.
        x = x.astype(compute_dtype)
        mats = {k: v.astype(compute_dtype) for k, v in mats.items()}

    weights = [mats["wa1"], ba1, mats["wa2"], ba2, mats["was"], bas,
               mats["wb1"], bb1, mats["wb2"], bb2, mats["wbs"], bbs,
               mats["twa"], tba, mats["twb"], tbb]

    # ---- batch tiling ----
    n_steps = max(min_grid_steps, pl.cdiv(B, block_b))
    if n_steps <= 1:
        TB = B
    else:
        TB = min(_round_up(pl.cdiv(B, n_steps), 8), _round_up(B, 8))
    grid = (pl.cdiv(B, TB),)

    x_spec = pl.BlockSpec((3, TB, F), lambda i: (0, i, 0))
    weight_specs = [pl.BlockSpec(w.shape, lambda i: (0, 0)) for w in weights]
    out_spec = pl.BlockSpec((TB, 2), lambda i: (i, 0))
    out_shape = jax.ShapeDtypeStruct((B, 2), x1.dtype)

    # ---- explicit scoped-VMEM budget (weights are grid-invariant blocks) ----
    weight_bytes = sum(w.size * w.dtype.itemsize for w in weights)
    act_cols = (2 * (n_sp * hidden + n_gate) + n_sh * hidden
                + (2 * n_sp + n_sh) * e_out + 4 * e_out + 2 * t_hidden + 2)
    vmem_need = (2 * weight_bytes                       # double-buffered weight blocks
                 + 2 * 3 * TB * F * x.dtype.itemsize    # double-buffered x tiles
                 + 2 * TB * 2 * 4                       # double-buffered out tiles
                 + 4 * TB * act_cols * 4)               # f32 intermediates + margin
    vmem_limit = int(min(100 * 2 ** 20, max(vmem_need + (2 << 20), 32 * 2 ** 20)))

    kernel = _make_ple_kernel(n_sp, n_sh, hidden, e_out, compute_dtype)

    out = pl.pallas_call(
        kernel,
        out_shape=out_shape,
        grid=grid,
        in_specs=[x_spec] + weight_specs,
        out_specs=out_spec,
        compiler_params=pltpu.CompilerParams(
            # Batch tiles are independent -> megacore sharding on v7x.
            dimension_semantics=("parallel",),
            vmem_limit_bytes=vmem_limit,
        ),
    )(x, *weights)

    return out[:, 0:1], out[:, 1:2]


# ---------------------------------------------------------------------------
# Parameter init (mirrors PyTorch nn.Linear default init, weights transposed)
# ---------------------------------------------------------------------------
def _init_linear(key, fan_in, fan_out, dtype=jnp.float32):
    kw, kb = jax.random.split(key)
    bound = 1.0 / (fan_in ** 0.5)
    w = jax.random.uniform(kw, (fan_in, fan_out), dtype, minval=-bound, maxval=bound)
    b = jax.random.uniform(kb, (1, fan_out), dtype, minval=-bound, maxval=bound)
    return w, b


def _init_expert_stack(key, n, in_size, hidden, out_size, dtype=jnp.float32):
    w1s, b1s, w2s, b2s = [], [], [], []
    for k in jax.random.split(key, n):
        k1, k2 = jax.random.split(k)
        w1, b1 = _init_linear(k1, in_size, hidden, dtype)
        w2, b2 = _init_linear(k2, hidden, out_size, dtype)
        w1s.append(w1); b1s.append(b1); w2s.append(w2); b2s.append(b2)
    return jnp.stack(w1s), jnp.stack(b1s), jnp.stack(w2s), jnp.stack(b2s)


def init_ple_params(key, input_size, n_specific, n_shared, experts_out,
                    experts_hidden, towers_hidden, dtype=jnp.float32):
    ks = jax.random.split(key, 9)
    e1 = _init_expert_stack(ks[0], n_specific, input_size, experts_hidden, experts_out, dtype)
    e2 = _init_expert_stack(ks[1], n_specific, input_size, experts_hidden, experts_out, dtype)
    es = _init_expert_stack(ks[2], n_shared, input_size, experts_hidden, experts_out, dtype)
    g1_w, g1_b = _init_linear(ks[3], input_size, n_specific + n_shared, dtype)
    g2_w, g2_b = _init_linear(ks[4], input_size, n_specific + n_shared, dtype)
    t1_w1, t1_b1 = _init_linear(ks[5], experts_out, towers_hidden, dtype)
    t1_w2, t1_b2 = _init_linear(ks[6], towers_hidden, 1, dtype)
    t2_w1, t2_b1 = _init_linear(ks[7], experts_out, towers_hidden, dtype)
    t2_w2, t2_b2 = _init_linear(ks[8], towers_hidden, 1, dtype)
    return dict(
        e1_w1=e1[0], e1_b1=e1[1], e1_w2=e1[2], e1_b2=e1[3],
        e2_w1=e2[0], e2_b1=e2[1], e2_w2=e2[2], e2_b2=e2[3],
        es_w1=es[0], es_b1=es[1], es_w2=es[2], es_b2=es[3],
        g1_w=g1_w, g1_b=g1_b, g2_w=g2_w, g2_b=g2_b,
        t1_w1=t1_w1, t1_b1=t1_b1, t1_w2=t1_w2, t1_b2=t1_b2,
        t2_w1=t2_w1, t2_b1=t2_b1, t2_w2=t2_w2, t2_b2=t2_b2,
    )


# ---------------------------------------------------------------------------
# Pure-JAX reference (eval mode; dropout == identity)
# ---------------------------------------------------------------------------
def ple_reference(x1, x2, xs, p):
    hp = jax.lax.Precision.HIGHEST

    def mlp(x, w1, b1, w2, b2):
        h = jnp.maximum(jnp.dot(x, w1, precision=hp) + b1, 0.0)
        return jnp.dot(h, w2, precision=hp) + b2

    n_sp = p["e1_w1"].shape[0]
    n_sh = p["es_w1"].shape[0]

    shared_o = jnp.stack([mlp(xs, p["es_w1"][e], p["es_b1"][e], p["es_w2"][e], p["es_b2"][e])
                          for e in range(n_sh)])
    task1_o = jnp.stack([mlp(x1, p["e1_w1"][e], p["e1_b1"][e], p["e1_w2"][e], p["e1_b2"][e])
                         for e in range(n_sp)])
    task2_o = jnp.stack([mlp(x2, p["e2_w1"][e], p["e2_b1"][e], p["e2_w2"][e], p["e2_b2"][e])
                         for e in range(n_sp)])

    sel1 = jax.nn.softmax(jnp.dot(x1, p["g1_w"], precision=hp) + p["g1_b"], axis=1)
    sel2 = jax.nn.softmax(jnp.dot(x2, p["g2_w"], precision=hp) + p["g2_b"], axis=1)

    gexp1 = jnp.concatenate([task1_o, shared_o], axis=0)
    gexp2 = jnp.concatenate([task2_o, shared_o], axis=0)
    gate1 = jnp.einsum("abc,ba->bc", gexp1, sel1, precision=hp)
    gate2 = jnp.einsum("abc,ba->bc", gexp2, sel2, precision=hp)

    out1 = mlp(gate1, p["t1_w1"], p["t1_b1"], p["t1_w2"], p["t1_b2"])
    out2 = mlp(gate2, p["t2_w1"], p["t2_b1"], p["t2_w2"], p["t2_b2"])
    return out1, out2


# ---------------------------------------------------------------------------
# Demo / correctness check
# ---------------------------------------------------------------------------
if __name__ == "__main__":
    B = 8
    INPUT_SIZE = 32
    NUM_SPECIFIC = 2
    NUM_SHARED = 2
    EXPERTS_OUT = 16
    EXPERTS_HIDDEN = 32
    TOWERS_HIDDEN = 16

    key = jax.random.PRNGKey(0)
    kx1, kx2, kxs, kp = jax.random.split(key, 4)
    x1 = jax.random.normal(kx1, (B, INPUT_SIZE), jnp.float32)
    x2 = jax.random.normal(kx2, (B, INPUT_SIZE), jnp.float32)
    x_share = jax.random.normal(kxs, (B, INPUT_SIZE), jnp.float32)

    params = init_ple_params(kp, INPUT_SIZE, NUM_SPECIFIC, NUM_SHARED,
                             EXPERTS_OUT, EXPERTS_HIDDEN, TOWERS_HIDDEN)

    out1, out2 = ple_output_forward(x1, x2, x_share, params)
    out1 = jax.block_until_ready(out1)
    out2 = jax.block_until_ready(out2)

    ref1, ref2 = ple_reference(x1, x2, x_share, params)
    assert out1.shape == (B, 1) and out2.shape == (B, 1)
    # Tolerance accounts for MXU f32 matmul pass structure vs. HIGHEST-precision ref.
    assert jnp.allclose(out1, ref1, atol=2e-3, rtol=2e-3)
    assert jnp.allclose(out2, ref2, atol=2e-3, rtol=2e-3)

    print("KERNEL_OK")
</pallas_src>

<mosaic_0001>
module attributes {stable_mosaic.version = 11 : i64} {
  func.func @kernel(%arg0: i32, %arg1: memref<3x8x32xf32, #tpu.memory_space<vmem>>, %arg2: memref<32x68xf32, #tpu.memory_space<vmem>>, %arg3: memref<1x68xf32, #tpu.memory_space<vmem>>, %arg4: memref<32x68xf32, #tpu.memory_space<vmem>>, %arg5: memref<1x68xf32, #tpu.memory_space<vmem>>, %arg6: memref<32x64xf32, #tpu.memory_space<vmem>>, %arg7: memref<1x64xf32, #tpu.memory_space<vmem>>, %arg8: memref<64x32xf32, #tpu.memory_space<vmem>>, %arg9: memref<1x32xf32, #tpu.memory_space<vmem>>, %arg10: memref<64x32xf32, #tpu.memory_space<vmem>>, %arg11: memref<1x32xf32, #tpu.memory_space<vmem>>, %arg12: memref<64x32xf32, #tpu.memory_space<vmem>>, %arg13: memref<1x32xf32, #tpu.memory_space<vmem>>, %arg14: memref<32x32xf32, #tpu.memory_space<vmem>>, %arg15: memref<1x32xf32, #tpu.memory_space<vmem>>, %arg16: memref<32x2xf32, #tpu.memory_space<vmem>>, %arg17: memref<1x2xf32, #tpu.memory_space<vmem>>, %arg18: memref<8x2xf32, #tpu.memory_space<vmem>>) attributes {dimension_semantics = [#tpu.dimension_semantics<parallel>], iteration_bounds = array<i64: 1>, scalar_prefetch = 0 : i64, scratch_operands = 0 : i64, tpu.core_type = #tpu.core_type<tc>, window_params = [{transform_indices = @transform_0, window_bounds = array<i64: 3, 8, 32>}, {pipeline_mode = #tpu.pipeline_mode<synchronous>, transform_indices = @transform_1, window_bounds = array<i64: 32, 68>}, {pipeline_mode = #tpu.pipeline_mode<synchronous>, transform_indices = @transform_2, window_bounds = array<i64: 1, 68>}, {pipeline_mode = #tpu.pipeline_mode<synchronous>, transform_indices = @transform_3, window_bounds = array<i64: 32, 68>}, {pipeline_mode = #tpu.pipeline_mode<synchronous>, transform_indices = @transform_4, window_bounds = array<i64: 1, 68>}, {pipeline_mode = #tpu.pipeline_mode<synchronous>, transform_indices = @transform_5, window_bounds = array<i64: 32, 64>}, {pipeline_mode = #tpu.pipeline_mode<synchronous>, transform_indices = @transform_6, window_bounds = array<i64: 1, 64>}, {pipeline_mode = #tpu.pipeline_mode<synchronous>, transform_indices = @transform_7, window_bounds = array<i64: 64, 32>}, {pipeline_mode = #tpu.pipeline_mode<synchronous>, transform_indices = @transform_8, window_bounds = array<i64: 1, 32>}, {pipeline_mode = #tpu.pipeline_mode<synchronous>, transform_indices = @transform_9, window_bounds = array<i64: 64, 32>}, {pipeline_mode = #tpu.pipeline_mode<synchronous>, transform_indices = @transform_10, window_bounds = array<i64: 1, 32>}, {pipeline_mode = #tpu.pipeline_mode<synchronous>, transform_indices = @transform_11, window_bounds = array<i64: 64, 32>}, {pipeline_mode = #tpu.pipeline_mode<synchronous>, transform_indices = @transform_12, window_bounds = array<i64: 1, 32>}, {pipeline_mode = #tpu.pipeline_mode<synchronous>, transform_indices = @transform_13, window_bounds = array<i64: 32, 32>}, {pipeline_mode = #tpu.pipeline_mode<synchronous>, transform_indices = @transform_14, window_bounds = array<i64: 1, 32>}, {pipeline_mode = #tpu.pipeline_mode<synchronous>, transform_indices = @transform_15, window_bounds = array<i64: 32, 2>}, {pipeline_mode = #tpu.pipeline_mode<synchronous>, transform_indices = @transform_16, window_bounds = array<i64: 1, 2>}, {transform_indices = @transform_17, window_bounds = array<i64: 8, 2>}]} {
    %c0 = arith.constant 0 : index
    %c0_0 = arith.constant 0 : index
    %c0_1 = arith.constant 0 : index
    %0 = vector.load %arg1[%c0, %c0_0, %c0_1] : memref<3x8x32xf32, #tpu.memory_space<vmem>>, vector<1x8x32xf32>
    %1 = vector.shape_cast %0 : vector<1x8x32xf32> to vector<8x32xf32>
    %c0_2 = arith.constant 0 : index
    %c0_3 = arith.constant 0 : index
    %2 = vector.load %arg2[%c0_2, %c0_3] : memref<32x68xf32, #tpu.memory_space<vmem>>, vector<32x68xf32>
    %cst = arith.constant dense<0.000000e+00> : vector<8x68xf32>
    %3 = tpu.matmul %1, %2, %cst {dimension_numbers = #tpu.dot_dimension_numbers<[1], [0], [0], [1], [0, 0, 1, 1], [], []>} : vector<8x32xf32>, vector<32x68xf32>, vector<8x68xf32> -> vector<8x68xf32>
    %c0_4 = arith.constant 0 : index
    %c0_5 = arith.constant 0 : index
    %4 = vector.load %arg3[%c0_4, %c0_5] : memref<1x68xf32, #tpu.memory_space<vmem>>, vector<1x68xf32>
    %5 = vector.broadcast %4 : vector<1x68xf32> to vector<8x68xf32>
    %6 = arith.addf %3, %5 : vector<8x68xf32>
    %7 = vector.extract_strided_slice %6 {offsets = [0, 0], sizes = [8, 64], strides = [1, 1]} : vector<8x68xf32> to vector<8x64xf32>
    %cst_6 = arith.constant 0.000000e+00 : f32
    %8 = vector.broadcast %cst_6 : f32 to vector<8x64xf32>
    %9 = arith.maximumf %7, %8 : vector<8x64xf32>
    %10 = vector.extract_strided_slice %6 {offsets = [0, 64], sizes = [8, 4], strides = [1, 1]} : vector<8x68xf32> to vector<8x4xf32>
    %cst_7 = arith.constant dense<0xFF800000> : vector<8xf32>
    %11 = vector.multi_reduction <maximumf>, %10, %cst_7 [1] : vector<8x4xf32> to vector<8xf32>
    %12 = vector.shape_cast %11 : vector<8xf32> to vector<8x1xf32>
    %13 = vector.broadcast %12 : vector<8x1xf32> to vector<8x4xf32>
    %14 = arith.subf %10, %13 : vector<8x4xf32>
    %15 = math.exp %14 : vector<8x4xf32>
    %cst_8 = arith.constant dense<0.000000e+00> : vector<8xf32>
    %16 = vector.multi_reduction <add>, %15, %cst_8 [1] : vector<8x4xf32> to vector<8xf32>
    %17 = vector.shape_cast %16 : vector<8xf32> to vector<8x1xf32>
    %18 = vector.broadcast %17 : vector<8x1xf32> to vector<8x4xf32>
    %19 = arith.divf %15, %18 : vector<8x4xf32>
    %c0_9 = arith.constant 0 : index
    %c0_10 = arith.constant 0 : index
    %20 = vector.load %arg8[%c0_9, %c0_10] : memref<64x32xf32, #tpu.memory_space<vmem>>, vector<64x32xf32>
    %cst_11 = arith.constant dense<0.000000e+00> : vector<8x32xf32>
    %21 = tpu.matmul %9, %20, %cst_11 {dimension_numbers = #tpu.dot_dimension_numbers<[1], [0], [0], [1], [0, 0, 1, 1], [], []>} : vector<8x64xf32>, vector<64x32xf32>, vector<8x32xf32> -> vector<8x32xf32>
    %c0_12 = arith.constant 0 : index
    %c0_13 = arith.constant 0 : index
    %22 = vector.load %arg9[%c0_12, %c0_13] : memref<1x32xf32, #tpu.memory_space<vmem>>, vector<1x32xf32>
    %23 = vector.broadcast %22 : vector<1x32xf32> to vector<8x32xf32>
    %24 = arith.addf %21, %23 : vector<8x32xf32>
    %c1 = arith.constant 1 : index
    %c0_14 = arith.constant 0 : index
    %c0_15 = arith.constant 0 : index
    %25 = vector.load %arg1[%c1, %c0_14, %c0_15] : memref<3x8x32xf32, #tpu.memory_space<vmem>>, vector<1x8x32xf32>
    %26 = vector.shape_cast %25 : vector<1x8x32xf32> to vector<8x32xf32>
    %c0_16 = arith.constant 0 : index
    %c0_17 = arith.constant 0 : index
    %27 = vector.load %arg4[%c0_16, %c0_17] : memref<32x68xf32, #tpu.memory_space<vmem>>, vector<32x68xf32>
    %cst_18 = arith.constant dense<0.000000e+00> : vector<8x68xf32>
    %28 = tpu.matmul %26, %27, %cst_18 {dimension_numbers = #tpu.dot_dimension_numbers<[1], [0], [0], [1], [0, 0, 1, 1], [], []>} : vector<8x32xf32>, vector<32x68xf32>, vector<8x68xf32> -> vector<8x68xf32>
    %c0_19 = arith.constant 0 : index
    %c0_20 = arith.constant 0 : index
    %29 = vector.load %arg5[%c0_19, %c0_20] : memref<1x68xf32, #tpu.memory_space<vmem>>, vector<1x68xf32>
    %30 = vector.broadcast %29 : vector<1x68xf32> to vector<8x68xf32>
    %31 = arith.addf %28, %30 : vector<8x68xf32>
    %32 = vector.extract_strided_slice %31 {offsets = [0, 0], sizes = [8, 64], strides = [1, 1]} : vector<8x68xf32> to vector<8x64xf32>
    %cst_21 = arith.constant 0.000000e+00 : f32
    %33 = vector.broadcast %cst_21 : f32 to vector<8x64xf32>
    %34 = arith.maximumf %32, %33 : vector<8x64xf32>
    %35 = vector.extract_strided_slice %31 {offsets = [0, 64], sizes = [8, 4], strides = [1, 1]} : vector<8x68xf32> to vector<8x4xf32>
    %cst_22 = arith.constant dense<0xFF800000> : vector<8xf32>
    %36 = vector.multi_reduction <maximumf>, %35, %cst_22 [1] : vector<8x4xf32> to vector<8xf32>
    %37 = vector.shape_cast %36 : vector<8xf32> to vector<8x1xf32>
    %38 = vector.broadcast %37 : vector<8x1xf32> to vector<8x4xf32>
    %39 = arith.subf %35, %38 : vector<8x4xf32>
    %40 = math.exp %39 : vector<8x4xf32>
    %cst_23 = arith.constant dense<0.000000e+00> : vector<8xf32>
    %41 = vector.multi_reduction <add>, %40, %cst_23 [1] : vector<8x4xf32> to vector<8xf32>
    %42 = vector.shape_cast %41 : vector<8xf32> to vector<8x1xf32>
    %43 = vector.broadcast %42 : vector<8x1xf32> to vector<8x4xf32>
    %44 = arith.divf %40, %43 : vector<8x4xf32>
    %c0_24 = arith.constant 0 : index
    %c0_25 = arith.constant 0 : index
    %45 = vector.load %arg10[%c0_24, %c0_25] : memref<64x32xf32, #tpu.memory_space<vmem>>, vector<64x32xf32>
    %cst_26 = arith.constant dense<0.000000e+00> : vector<8x32xf32>
    %46 = tpu.matmul %34, %45, %cst_26 {dimension_numbers = #tpu.dot_dimension_numbers<[1], [0], [0], [1], [0, 0, 1, 1], [], []>} : vector<8x64xf32>, vector<64x32xf32>, vector<8x32xf32> -> vector<8x32xf32>
    %c0_27 = arith.constant 0 : index
    %c0_28 = arith.constant 0 : index
    %47 = vector.load %arg11[%c0_27, %c0_28] : memref<1x32xf32, #tpu.memory_space<vmem>>, vector<1x32xf32>
    %48 = vector.broadcast %47 : vector<1x32xf32> to vector<8x32xf32>
    %49 = arith.addf %46, %48 : vector<8x32xf32>
    %c2 = arith.constant 2 : index
    %c0_29 = arith.constant 0 : index
    %c0_30 = arith.constant 0 : index
    %50 = vector.load %arg1[%c2, %c0_29, %c0_30] : memref<3x8x32xf32, #tpu.memory_space<vmem>>, vector<1x8x32xf32>
    %51 = vector.shape_cast %50 : vector<1x8x32xf32> to vector<8x32xf32>
    %c0_31 = arith.constant 0 : index
    %c0_32 = arith.constant 0 : index
    %52 = vector.load %arg6[%c0_31, %c0_32] : memref<32x64xf32, #tpu.memory_space<vmem>>, vector<32x64xf32>
    %cst_33 = arith.constant dense<0.000000e+00> : vector<8x64xf32>
    %53 = tpu.matmul %51, %52, %cst_33 {dimension_numbers = #tpu.dot_dimension_numbers<[1], [0], [0], [1], [0, 0, 1, 1], [], []>} : vector<8x32xf32>, vector<32x64xf32>, vector<8x64xf32> -> vector<8x64xf32>
    %c0_34 = arith.constant 0 : index
    %c0_35 = arith.constant 0 : index
    %54 = vector.load %arg7[%c0_34, %c0_35] : memref<1x64xf32, #tpu.memory_space<vmem>>, vector<1x64xf32>
    %55 = vector.broadcast %54 : vector<1x64xf32> to vector<8x64xf32>
    %56 = arith.addf %53, %55 : vector<8x64xf32>
    %cst_36 = arith.constant 0.000000e+00 : f32
    %57 = vector.broadcast %cst_36 : f32 to vector<8x64xf32>
    %58 = arith.maximumf %56, %57 : vector<8x64xf32>
    %c0_37 = arith.constant 0 : index
    %c0_38 = arith.constant 0 : index
    %59 = vector.load %arg12[%c0_37, %c0_38] : memref<64x32xf32, #tpu.memory_space<vmem>>, vector<64x32xf32>
    %cst_39 = arith.constant dense<0.000000e+00> : vector<8x32xf32>
    %60 = tpu.matmul %58, %59, %cst_39 {dimension_numbers = #tpu.dot_dimension_numbers<[1], [0], [0], [1], [0, 0, 1, 1], [], []>} : vector<8x64xf32>, vector<64x32xf32>, vector<8x32xf32> -> vector<8x32xf32>
    %c0_40 = arith.constant 0 : index
    %c0_41 = arith.constant 0 : index
    %61 = vector.load %arg13[%c0_40, %c0_41] : memref<1x32xf32, #tpu.memory_space<vmem>>, vector<1x32xf32>
    %62 = vector.broadcast %61 : vector<1x32xf32> to vector<8x32xf32>
    %63 = arith.addf %60, %62 : vector<8x32xf32>
    %64 = vector.extract_strided_slice %19 {offsets = [0, 0], sizes = [8, 1], strides = [1, 1]} : vector<8x4xf32> to vector<8x1xf32>
    %65 = vector.extract_strided_slice %24 {offsets = [0, 0], sizes = [8, 16], strides = [1, 1]} : vector<8x32xf32> to vector<8x16xf32>
    %66 = vector.broadcast %64 : vector<8x1xf32> to vector<8x16xf32>
    %67 = arith.mulf %66, %65 : vector<8x16xf32>
    %68 = vector.extract_strided_slice %44 {offsets = [0, 0], sizes = [8, 1], strides = [1, 1]} : vector<8x4xf32> to vector<8x1xf32>
    %69 = vector.extract_strided_slice %49 {offsets = [0, 0], sizes = [8, 16], strides = [1, 1]} : vector<8x32xf32> to vector<8x16xf32>
    %70 = vector.broadcast %68 : vector<8x1xf32> to vector<8x16xf32>
    %71 = arith.mulf %70, %69 : vector<8x16xf32>
    %72 = vector.extract_strided_slice %19 {offsets = [0, 1], sizes = [8, 1], strides = [1, 1]} : vector<8x4xf32> to vector<8x1xf32>
    %73 = vector.extract_strided_slice %24 {offsets = [0, 16], sizes = [8, 16], strides = [1, 1]} : vector<8x32xf32> to vector<8x16xf32>
    %74 = vector.broadcast %72 : vector<8x1xf32> to vector<8x16xf32>
    %75 = arith.mulf %74, %73 : vector<8x16xf32>
    %76 = arith.addf %67, %75 : vector<8x16xf32>
    %77 = vector.extract_strided_slice %44 {offsets = [0, 1], sizes = [8, 1], strides = [1, 1]} : vector<8x4xf32> to vector<8x1xf32>
    %78 = vector.extract_strided_slice %49 {offsets = [0, 16], sizes = [8, 16], strides = [1, 1]} : vector<8x32xf32> to vector<8x16xf32>
    %79 = vector.broadcast %77 : vector<8x1xf32> to vector<8x16xf32>
    %80 = arith.mulf %79, %78 : vector<8x16xf32>
    %81 = arith.addf %71, %80 : vector<8x16xf32>
    %82 = vector.extract_strided_slice %63 {offsets = [0, 0], sizes = [8, 16], strides = [1, 1]} : vector<8x32xf32> to vector<8x16xf32>
    %83 = vector.extract_strided_slice %19 {offsets = [0, 2], sizes = [8, 1], strides = [1, 1]} : vector<8x4xf32> to vector<8x1xf32>
    %84 = vector.broadcast %83 : vector<8x1xf32> to vector<8x16xf32>
    %85 = arith.mulf %84, %82 : vector<8x16xf32>
    %86 = arith.addf %76, %85 : vector<8x16xf32>
    %87 = vector.extract_strided_slice %44 {offsets = [0, 2], sizes = [8, 1], strides = [1, 1]} : vector<8x4xf32> to vector<8x1xf32>
    %88 = vector.broadcast %87 : vector<8x1xf32> to vector<8x16xf32>
    %89 = arith.mulf %88, %82 : vector<8x16xf32>
    %90 = arith.addf %81, %89 : vector<8x16xf32>
    %91 = vector.extract_strided_slice %63 {offsets = [0, 16], sizes = [8, 16], strides = [1, 1]} : vector<8x32xf32> to vector<8x16xf32>
    %92 = vector.extract_strided_slice %19 {offsets = [0, 3], sizes = [8, 1], strides = [1, 1]} : vector<8x4xf32> to vector<8x1xf32>
    %93 = vector.broadcast %92 : vector<8x1xf32> to vector<8x16xf32>
    %94 = arith.mulf %93, %91 : vector<8x16xf32>
    %95 = arith.addf %86, %94 : vector<8x16xf32>
    %96 = vector.extract_strided_slice %44 {offsets = [0, 3], sizes = [8, 1], strides = [1, 1]} : vector<8x4xf32> to vector<8x1xf32>
    %97 = vector.broadcast %96 : vector<8x1xf32> to vector<8x16xf32>
    %98 = arith.mulf %97, %91 : vector<8x16xf32>
    %99 = arith.addf %90, %98 : vector<8x16xf32>
    %100 = tpu.concatenate %95, %99 in 1 : vector<8x16xf32>, vector<8x16xf32> -> vector<8x32xf32>
    %c0_42 = arith.constant 0 : index
    %c0_43 = arith.constant 0 : index
    %101 = vector.load %arg14[%c0_42, %c0_43] : memref<32x32xf32, #tpu.memory_space<vmem>>, vector<32x32xf32>
    %cst_44 = arith.constant dense<0.000000e+00> : vector<8x32xf32>
    %102 = tpu.matmul %100, %101, %cst_44 {dimension_numbers = #tpu.dot_dimension_numbers<[1], [0], [0], [1], [0, 0, 1, 1], [], []>} : vector<8x32xf32>, vector<32x32xf32>, vector<8x32xf32> -> vector<8x32xf32>
    %c0_45 = arith.constant 0 : index
    %c0_46 = arith.constant 0 : index
    %103 = vector.load %arg15[%c0_45, %c0_46] : memref<1x32xf32, #tpu.memory_space<vmem>>, vector<1x32xf32>
    %104 = vector.broadcast %103 : vector<1x32xf32> to vector<8x32xf32>
    %105 = arith.addf %102, %104 : vector<8x32xf32>
    %cst_47 = arith.constant 0.000000e+00 : f32
    %106 = vector.broadcast %cst_47 : f32 to vector<8x32xf32>
    %107 = arith.maximumf %105, %106 : vector<8x32xf32>
    %c0_48 = arith.constant 0 : index
    %c0_49 = arith.constant 0 : index
    %108 = vector.load %arg16[%c0_48, %c0_49] : memref<32x2xf32, #tpu.memory_space<vmem>>, vector<32x2xf32>
    %cst_50 = arith.constant dense<0.000000e+00> : vector<8x2xf32>
    %109 = tpu.matmul %107, %108, %cst_50 {dimension_numbers = #tpu.dot_dimension_numbers<[1], [0], [0], [1], [0, 0, 1, 1], [], []>} : vector<8x32xf32>, vector<32x2xf32>, vector<8x2xf32> -> vector<8x2xf32>
    %c0_51 = arith.constant 0 : index
    %c0_52 = arith.constant 0 : index
    %110 = vector.load %arg17[%c0_51, %c0_52] : memref<1x2xf32, #tpu.memory_space<vmem>>, vector<1x2xf32>
    %111 = vector.broadcast %110 : vector<1x2xf32> to vector<8x2xf32>
    %112 = arith.addf %109, %111 : vector<8x2xf32>
    %c0_53 = arith.constant 0 : index
    %c0_54 = arith.constant 0 : index
    %113 = vector.load %arg18[%c0_53, %c0_54] : memref<8x2xf32, #tpu.memory_space<vmem>>, vector<8x2xf32>
    tpu.vector_store %arg18[%c0_53, %c0_54], %112 {strides = array<i32>} : memref<8x2xf32, #tpu.memory_space<vmem>>, vector<8x2xf32>,
    return
  }
  func.func @transform_0(%arg0: i32) -> (i32, i32, i32) {
    %c0_i32 = arith.constant 0 : i32
    %c0_i32_0 = arith.constant 0 : i32
    %c0_i32_1 = arith.constant 0 : i32
    return %c0_i32, %arg0, %c0_i32_0 : i32, i32, i32
  }
  func.func @transform_1(%arg0: i32) -> (i32, i32) {
    %c0_i32 = arith.constant 0 : i32
    %c0_i32_0 = arith.constant 0 : i32
    %c0_i32_1 = arith.constant 0 : i32
    return %c0_i32, %c0_i32_0 : i32, i32
  }
  func.func @transform_2(%arg0: i32) -> (i32, i32) {
    %c0_i32 = arith.constant 0 : i32
    %c0_i32_0 = arith.constant 0 : i32
    %c0_i32_1 = arith.constant 0 : i32
    return %c0_i32, %c0_i32_0 : i32, i32
  }
  func.func @transform_3(%arg0: i32) -> (i32, i32) {
    %c0_i32 = arith.constant 0 : i32
    %c0_i32_0 = arith.constant 0 : i32
    %c0_i32_1 = arith.constant 0 : i32
    return %c0_i32, %c0_i32_0 : i32, i32
  }
  func.func @transform_4(%arg0: i32) -> (i32, i32) {
    %c0_i32 = arith.constant 0 : i32
    %c0_i32_0 = arith.constant 0 : i32
    %c0_i32_1 = arith.constant 0 : i32
    return %c0_i32, %c0_i32_0 : i32, i32
  }
  func.func @transform_5(%arg0: i32) -> (i32, i32) {
    %c0_i32 = arith.constant 0 : i32
    %c0_i32_0 = arith.constant 0 : i32
    %c0_i32_1 = arith.constant 0 : i32
    return %c0_i32, %c0_i32_0 : i32, i32
  }
  func.func @transform_6(%arg0: i32) -> (i32, i32) {
    %c0_i32 = arith.constant 0 : i32
    %c0_i32_0 = arith.constant 0 : i32
    %c0_i32_1 = arith.constant 0 : i32
    return %c0_i32, %c0_i32_0 : i32, i32
  }
  func.func @transform_7(%arg0: i32) -> (i32, i32) {
    %c0_i32 = arith.constant 0 : i32
    %c0_i32_0 = arith.constant 0 : i32
    %c0_i32_1 = arith.constant 0 : i32
    return %c0_i32, %c0_i32_0 : i32, i32
  }
  func.func @transform_8(%arg0: i32) -> (i32, i32) {
    %c0_i32 = arith.constant 0 : i32
    %c0_i32_0 = arith.constant 0 : i32
    %c0_i32_1 = arith.constant 0 : i32
    return %c0_i32, %c0_i32_0 : i32, i32
  }
  func.func @transform_9(%arg0: i32) -> (i32, i32) {
    %c0_i32 = arith.constant 0 : i32
    %c0_i32_0 = arith.constant 0 : i32
    %c0_i32_1 = arith.constant 0 : i32
    return %c0_i32, %c0_i32_0 : i32, i32
  }
  func.func @transform_10(%arg0: i32) -> (i32, i32) {
    %c0_i32 = arith.constant 0 : i32
    %c0_i32_0 = arith.constant 0 : i32
    %c0_i32_1 = arith.constant 0 : i32
    return %c0_i32, %c0_i32_0 : i32, i32
  }
  func.func @transform_11(%arg0: i32) -> (i32, i32) {
    %c0_i32 = arith.constant 0 : i32
    %c0_i32_0 = arith.constant 0 : i32
    %c0_i32_1 = arith.constant 0 : i32
    return %c0_i32, %c0_i32_0 : i32, i32
  }
  func.func @transform_12(%arg0: i32) -> (i32, i32) {
    %c0_i32 = arith.constant 0 : i32
    %c0_i32_0 = arith.constant 0 : i32
    %c0_i32_1 = arith.constant 0 : i32
    return %c0_i32, %c0_i32_0 : i32, i32
  }
  func.func @transform_13(%arg0: i32) -> (i32, i32) {
    %c0_i32 = arith.constant 0 : i32
    %c0_i32_0 = arith.constant 0 : i32
    %c0_i32_1 = arith.constant 0 : i32
    return %c0_i32, %c0_i32_0 : i32, i32
  }
  func.func @transform_14(%arg0: i32) -> (i32, i32) {
    %c0_i32 = arith.constant 0 : i32
    %c0_i32_0 = arith.constant 0 : i32
    %c0_i32_1 = arith.constant 0 : i32
    return %c0_i32, %c0_i32_0 : i32, i32
  }
  func.func @transform_15(%arg0: i32) -> (i32, i32) {
    %c0_i32 = arith.constant 0 : i32
    %c0_i32_0 = arith.constant 0 : i32
    %c0_i32_1 = arith.constant 0 : i32
    return %c0_i32, %c0_i32_0 : i32, i32
  }
  func.func @transform_16(%arg0: i32) -> (i32, i32) {
    %c0_i32 = arith.constant 0 : i32
    %c0_i32_0 = arith.constant 0 : i32
    %c0_i32_1 = arith.constant 0 : i32
    return %c0_i32, %c0_i32_0 : i32, i32
  }
  func.func @transform_17(%arg0: i32) -> (i32, i32) {
    %c0_i32 = arith.constant 0 : i32
    %c0_i32_0 = arith.constant 0 : i32
    return %arg0, %c0_i32 : i32, i32
  }
}

</mosaic_0001>

<bundles_post_ra>
// kernel: tpu_custom_call.1
= control target key start
LH: loop header
LB: loop body
LE: loop exit
PB: predicated region body
PF: predicated region fallthrough
CT: control target
= control target key end

     0   :  { %vm65_vm0 = vcmask 261120   ;;  %vm132_vm1 = vcmask 523264   ;;  %vm90_vm2 = vcmask 556544   ;;  %s502_s28 = smov 64   ;;  %vm101_vm3 = vcmask 31744   ;;  %s508_s20 = smov 16   ;;  %s783_s3 = inlined_call_operand.vmem [shape: f32[32,68], index: 3, kind: input, shape index: {}]   ;;  %s784_s1 = inlined_call_operand.vmem [shape: f32[32,68], index: 1, kind: input, shape index: {}]   ;;  %s785_s9 = inlined_call_operand.vmem [shape: f32[64,32], index: 9, kind: input, shape index: {}]   ;;  %s786_s0 = inlined_call_operand.vmem [shape: f32[3,8,32], index: 0, kind: input, shape index: {}]   ;;  %s787_s4 = inlined_call_operand.vmem [shape: f32[1,68], index: 4, kind: input, shape index: {}]   ;;  %s788_s2 = inlined_call_operand.vmem [shape: f32[1,68], index: 2, kind: input, shape index: {}]   ;;  %s789_s7 = inlined_call_operand.vmem [shape: f32[64,32], index: 7, kind: input, shape index: {}]   ;;  %s790_s10 = inlined_call_operand.vmem [shape: f32[1,32], index: 10, kind: input, shape index: {}]   ;;  %s791_s8 = inlined_call_operand.vmem [shape: f32[1,32], index: 8, kind: input, shape index: {}]   ;;  %s792_s5 = inlined_call_operand.vmem [shape: f32[32,64], index: 5, kind: input, shape index: {}]   ;;  %s793_s6 = inlined_call_operand.vmem [shape: f32[1,64], index: 6, kind: input, shape index: {}]   ;;  %s794_s11 = inlined_call_operand.vmem [shape: f32[64,32], index: 11, kind: input, shape index: {}]   ;;  %s795_s12 = inlined_call_operand.vmem [shape: f32[1,32], index: 12, kind: input, shape index: {}]   ;;  %s796_s13 = inlined_call_operand.vmem [shape: f32[32,32], index: 13, kind: input, shape index: {}]   ;;  %s797_s14 = inlined_call_operand.vmem [shape: f32[1,32], index: 14, kind: input, shape index: {}]   ;;  %s798_s15 = inlined_call_operand.vmem [shape: f32[32,2], index: 15, kind: input, shape index: {}]   ;;  %s799_s16 = inlined_call_operand.vmem [shape: f32[1,2], index: 16, kind: input, shape index: {}]   ;;  %s800_s17 = inlined_call_operand.vmem [shape: f32[8,2], index: 17, kind: output, shape index: {}]  }
   0x1   :  { %803 = sst [smem:[#allocation2_spill]] %s783_s3  ;;  %v225_v6 = vld [vmem:[%s785_s9 + $0x38] sm:$0xff]  ;;  %v224_v7 = vld [vmem:[%s785_s9 + $0x30] sm:$0xff]  ;;  %v463_v9 = vld [vmem:[%s786_s0 + $0x8] sm:$0xff]  ;;  %vm390_vm12 = vcmask 130048   ;;  %vm455_vm13 = vcmask 15360  }
   0x2   :  { %804 = sst [smem:[#allocation3_spill]] %s784_s1  ;;  %241 = vmatpush.msra.mxu3 %v225_v6  ;;  %v56_v11 = vld [vmem:[%s786_s0] sm:$0xff]  ;;  %v223_v12 = vld [vmem:[%s785_s9 + $0x28] sm:$0xff]  ;;  %v221_v14 = vld [vmem:[%s785_s9 + $0x18] sm:$0xff] }
   0x3   :  { %s805_s26 = sld [smem:[#allocation2_spill]]  ;;  %v222_v13 = vld [vmem:[%s785_s9 + $0x20] sm:$0xff]  ;;  %v220_v15 = vld [vmem:[%s785_s9 + $0x10] sm:$0xff]  ;;  %v219_v16 = vld [vmem:[%s785_s9 + $0x8] sm:$0xff] }
   0x4   :  { %s806_s30 = sld [smem:[#allocation3_spill]]  ;;  %242 = vmatpush.msra.mxu3 %v224_v7  ;;  %v218_v17 = vld [vmem:[%s785_s9] sm:$0xff]  ;;  %v127_v18 = vld [vmem:[%s789_s7 + $0x38] sm:$0xff]  ;;  %v126_v19 = vld [vmem:[%s789_s7 + $0x30] sm:$0xff] }
   0x5   :  { %144 = vmatpush.msra.mxu1 %v127_v18  ;;  %v125_v20 = vld [vmem:[%s789_s7 + $0x28] sm:$0xff]  ;;  %v124_v21 = vld [vmem:[%s789_s7 + $0x20] sm:$0xff]  ;;  %v123_v22 = vld [vmem:[%s789_s7 + $0x18] sm:$0xff] }
   0x6   :  { %243 = vmatpush.msra.mxu3 %v223_v12  ;;  %v122_v23 = vld [vmem:[%s789_s7 + $0x10] sm:$0xff]  ;;  %v121_v24 = vld [vmem:[%s789_s7 + $0x8] sm:$0xff]  ;;  %v487_v25 = vld [vmem:[%s788_s2] ss:$0 sm:$0xff] }
   0x7   :  { %145 = vmatpush.msra.mxu1 %v126_v19  ;;  %v120_v26 = vld [vmem:[%s789_s7] sm:$0xff]  ;;  %v258_v36 = vld [vmem:[%s792_s5 + $0x18] sm:$0xff]  ;;  %v257_v37 = vld [vmem:[%s792_s5 + $0x10] sm:$0xff] }
   0x8   :  { %244 = vmatpush.msra.mxu3 %v222_v13  ;;  %v486_v29 = vld [vmem:[%s787_s4] ss:$0 sm:$0xff]  ;;  %v256_v38 = vld [vmem:[%s792_s5 + $0x8] sm:$0xff]  ;;  %v466_v40 = vld [vmem:[%s786_s0 + $0x10] sm:$0xff] }
   0x9   :  { %v161_v0 = vld [vmem:[%s805_s26 + $0x18] sm:$0xff]  ;;  %v160_v1 = vld [vmem:[%s805_s26 + $0x10] sm:$0xff]  ;;  %v159_v3 = vld [vmem:[%s805_s26 + $0x8] sm:$0xff]  ;;  %146 = vmatpush.msra.mxu1 %v125_v20 }
   0xa   :  { %181 = vmatpush.msra.mxu2 %v161_v0  ;;  %v60_v2 = vld [vmem:[%s806_s30 + $0x18] sm:$0xff]  ;;  %v59_v4 = vld [vmem:[%s806_s30 + $0x10] sm:$0xff]  ;;  %v58_v5 = vld [vmem:[%s806_s30 + $0x8] sm:$0xff]  ;;  %245 = vmatpush.msra.mxu3 %v221_v14 }
   0xb   :  { %81 = vmatpush.msra.mxu0 %v60_v2  ;;  %v158_v8 = vld [vmem:[%s805_s26] sm:$0xff]  ;;  %147 = vmatpush.msra.mxu1 %v124_v21  ;;  %v294_v49 = vld [vmem:[%s794_s11 + $0x38] sm:$0xff]  ;;  %v293_v50 = vld [vmem:[%s794_s11 + $0x30] sm:$0xff]  ;;  %v504_v2 = vmov 65  }
   0xc   :  { %182 = vmatpush.msra.mxu2 %v160_v1  ;;  %v57_v10 = vld [vmem:[%s806_s30] sm:$0xff]  ;;  %246 = vmatpush.msra.mxu3 %v220_v15  ;;  %v292_v51 = vld [vmem:[%s794_s11 + $0x28] sm:$0xff]  ;;  %v290_v53 = vld [vmem:[%s794_s11 + $0x18] sm:$0xff]  ;;  %v503_v1 = vmov 67  }
   0xd   :  { %82 = vmatpush.msra.mxu0 %v59_v4  ;;  %148 = vmatpush.msra.mxu1 %v123_v22  ;;  %v255_v39 = vld [vmem:[%s792_s5] sm:$0xff]  ;;  %v289_v54 = vld [vmem:[%s794_s11 + $0x10] sm:$0xff]  ;;  %v288_v55 = vld [vmem:[%s794_s11 + $0x8] sm:$0xff] }
   0xe   :  { %183 = vmatpush.msra.mxu2 %v159_v3  ;;  %247 = vmatpush.msra.mxu3 %v219_v16  ;;  %v291_v52 = vld [vmem:[%s794_s11 + $0x20] sm:$0xff]  ;;  %v505_v3 = vmov 64  }
   0xf   :  { %83 = vmatpush.msra.mxu0 %v58_v5  ;;  %149 = vmatpush.msra.mxu1 %v122_v23  ;;  %v287_v56 = vld [vmem:[%s794_s11] sm:$0xff] }
  0x10   :  { %184 = vmatpush.msra.mxu2 %v158_v8  ;;  %248 = vmatpush.msra.mxu3 %v218_v17  ;;  %v490_v57 = vld [vmem:[%s793_s6] ss:$0 sm:$0xff] }
  0x11   :  { %464 = vmatmul.msk.f32.vlgmr.msra.gmra.mxu2 %vm65_vm0, %v463_v9  ;;  %84 = vmatpush.msra.mxu0 %v57_v10 }
  0x12   :  { %461 = vmatmul.msk.f32.vlgmr.msra.gmra.mxu0 %vm65_vm0, %v56_v11  ;;  %150 = vmatpush.msra.mxu1 %v121_v24 }
  0x13   :  { %278 = vmatpush.msrb.mxu0 %v258_v36  ;;  %310 = vmatpush.msrb.mxu2 %v294_v49  ;;  %v394_v49 = vld [vmem:[%s796_s13 + $0x10] sm:$0xff] }
  0x14   :  { %151 = vmatpush.msra.mxu1 %v120_v26  ;;  %479 = vset.pattern.permute.xlu1 %v503_v1 }
  0x15   :  { %279 = vmatpush.msrb.mxu0 %v257_v37  ;;  %311 = vmatpush.msrb.mxu2 %v293_v50  ;;  %v393_v50 = vld [vmem:[%s796_s13 + $0x8] sm:$0xff] }
  0x16   :  { %478 = vset.pattern.permute.xlu0 %v504_v2  ;;  %481 = vset.pattern.permute.xlu2 %v505_v3 }
  0x17   :  { %280 = vmatpush.msrb.mxu0 %v256_v38  ;;  %312 = vmatpush.msrb.mxu2 %v292_v51 }
  0x19   :  { %281 = vmatpush.msrb.mxu0 %v255_v39  ;;  %313 = vmatpush.msrb.mxu2 %v291_v52  ;;  %v392_v52 = vld [vmem:[%s796_s13] sm:$0xff] }
  0x1a   :  { %467 = vmatmul.msk.f32.vlgmr.msrb.gmra.mxu0 %vm65_vm0, %v466_v40 }
  0x1b   :  { %314 = vmatpush.msrb.mxu2 %v290_v53 }
  0x1d   :  { %315 = vmatpush.msrb.mxu2 %v289_v54 }
  0x1f   :  { %316 = vmatpush.msrb.mxu2 %v288_v55 }
  0x21   :  { %317 = vmatpush.msrb.mxu2 %v287_v56 }
  0x8f   :  { %v86_v27 = vpop.f32.mrf.mxu0 }
  0x90   :  { %v87_v28 = vadd.f32 %v487_v25, %v86_v27 }
  0x92   :  { %v89_v30 = vmax.f32 %v87_v28, 0.0  ;;  %v91_v35 = vsel %vm90_vm2, %v87_v28, -inf }
  0x94   :  { %v186_v31 = vpop.f32.mrf.mxu2  ;;  %462 = vmatmul.msk.f32.vlgmr.msra.gmra.mxu1 %vm132_vm1, %v89_v30 }
  0x95   :  { %v187_v32 = vadd.f32 %v486_v29, %v186_v31  ;;  %v488_v29 = vld [vmem:[%s790_s10] ss:$0 sm:$0xff] }
  0x97   :  { %v190_v33 = vsel %vm90_vm2, %v187_v32, -inf  ;;  %v189_v34 = vmax.f32 %v187_v32, 0.0  ;;  %v283_v58 = vpop.f32.mrf.mxu0 }
  0x98   :  { %191 = vmax.xlane.f32.xlu0 %v190_v33  ;;  %v284_v59 = vadd.f32 %v490_v57, %v283_v58 }
  0x99   :  { %465 = vmatmul.msk.f32.vlgmr.msra.gmra.mxu3 %vm132_vm1, %v189_v34  ;;  %v491_v34 = vld [vmem:[%s795_s12] ss:$0 sm:$0xff] }
  0x9a   :  { %v286_v60 = vmax.f32 %v284_v59, 0.0  ;;  %v427_v59 = vld [vmem:[%s798_s15 + $0x18] sm:$0xff] }
  0x9b   :  { %447 = vmatpush.msrb.mxu1 %v427_v59 }
  0x9c   :  { %468 = vmatmul.msk.f32.vlgmr.msrb.gmra.mxu2 %vm132_vm1, %v286_v60  ;;  %v426_v60 = vld [vmem:[%s798_s15 + $0x10] sm:$0xff] }
  0x9d   :  { %448 = vmatpush.msrb.mxu1 %v426_v60 }
  0xa0   :  { %92 = vmax.xlane.f32.xlu0 %v91_v35 }
 0x10b   :  { %v192_v41 = vpop.xlane.xlu0 %191 }
 0x10c   :  { %v193_v42 = vsub.f32 %v187_v32, %v192_v41 }
 0x10e   :  { %v194_v43 = vmul.f32 1.442695, %v193_v42  ;;  %v489_v42 = vld [vmem:[%s791_s8] ss:$0 sm:$0xff] }
 0x110   :  { %494 = vpow2.f32 %v194_v43 }
 0x111   :  { %v153_v43 = vpop.f32.mrf.mxu1 }
 0x113   :  { %v93_v44 = vpop.xlane.xlu0 %92 }
 0x114   :  { %v94_v45 = vsub.f32 %v87_v28, %v93_v44  ;;  %v506_v28 = vmov 66   ;;  %v154_v44 = vadd.f32 %v489_v42, %v153_v43 }
 0x116   :  { %v703_v46 = vpop.eup %494  ;;  %v95_v47 = vmul.f32 1.442695, %v94_v45 }
 0x117   :  { %197 = vrot.lane.b32.xlu1 %v703_v46, %s502_s28 }
 0x118   :  { %496 = vpow2.f32 %v95_v47 }
 0x11c   :  { %v250_v30 = vpop.f32.mrf.mxu3 }
 0x11d   :  { %v251_v31 = vadd.f32 %v488_v29, %v250_v30 }
 0x11e   :  { %v706_v48 = vpop.eup %496 }
 0x11f   :  { %98 = vrot.lane.b32.xlu1 %v706_v48, %s502_s28  ;;  %v319_v35 = vpop.f32.mrf.mxu2  ;;  %s507_s28 = smov 112  }
 0x120   :  { %v320_v36 = vadd.f32 %v491_v34, %v319_v35 }
 0x189   :  { %v198_v61 = vpop.permute.xlu1 %197 }
 0x18a   :  { %v200_v62 = vsel %vm101_vm3, %v198_v61, 0.0 }
 0x18b   :  { %201 = vadd.xlane.f32.xlu2 %v200_v62 }
 0x191   :  { %v99_v63 = vpop.permute.xlu1 %98 }
 0x192   :  { %v102_v0 = vsel %vm101_vm3, %v99_v63, 0.0 }
 0x193   :  { %103 = vadd.xlane.f32.xlu2 %v102_v0 }
 0x1fe   :  { %v202_v4 = vpop.xlane.xlu2 %201 }
 0x1ff   :  { %498 = vrcp.f32 %v202_v4  ;;  %v214_v9 = vand.u32 2147483648, %v202_v4  ;;  %v212_v11 = vand.u32 2147483647, %v202_v4  ;;  %vm208_vm5 = vweird.f32 %v202_v4 }
 0x201   :  { %v215_v14 = vor.u32 1.1754944e-38, %v214_v9  ;;  %vm213_vm7 = vcmp.eq.f32.partialorder %v212_v11, 8.507059e+37  ;;  %v424_v9 = vld [vmem:[%s798_s15] sm:$0xff] }
 0x205   :  { %v499_v5 = vpop.eup %498 }
 0x206   :  { %v204_v6 = vmul.f32 %v499_v5, %v202_v4  ;;  %v104_v7 = vpop.xlane.xlu2 %103  ;;  %vm209_vm4 = vweird.f32 %v499_v5 }
 0x207   :  { %500 = vrcp.f32 %v104_v7  ;;  %vm210_vm6 = vmor %vm208_vm5, %vm209_vm4  ;;  %v116_v20 = vand.u32 2147483648, %v104_v7  ;;  %v114_v22 = vand.u32 2147483647, %v104_v7  ;;  %vm110_vm9 = vweird.f32 %v104_v7 }
 0x208   :  { %v205_v8 = vsub.f32 1.0, %v204_v6 }
 0x209   :  { %v117_v24 = vor.u32 1.1754944e-38, %v116_v20  ;;  %vm115_vm11 = vcmp.eq.f32.partialorder %v114_v22, 8.507059e+37 }
 0x20a   :  { %v206_v10 = vmul.f32 %v499_v5, %v205_v8  ;;  %v425_v8 = vld [vmem:[%s798_s15 + $0x8] sm:$0xff] }
 0x20b   :  { %449 = vmatpush.msrb.mxu1 %v425_v8 }
 0x20c   :  { %v207_v12 = vadd.f32 %v499_v5, %v206_v10  ;;  %v492_v10 = vld [vmem:[%s797_s14] ss:$0 sm:$0xff] }
 0x20d   :  { %v501_v13 = vpop.eup %500  ;;  %450 = vmatpush.msrb.mxu1 %v424_v9 }
 0x20e   :  { %v106_v15 = vmul.f32 %v501_v13, %v104_v7  ;;  %v211_v16 = vsel %vm210_vm6, %v499_v5, %v207_v12  ;;  %vm111_vm8 = vweird.f32 %v501_v13 }
 0x20f   :  { %v216_v17 = vsel %vm213_vm7, %v215_v14, %v211_v16  ;;  %vm112_vm10 = vmor %vm110_vm9, %vm111_vm8  ;;  %v493_v14 = vld [vmem:[%s799_s16] ss:$0 sm:$0xff] }
 0x210   :  { %v107_v18 = vsub.f32 1.0, %v106_v15  ;;  %v217_v19 = vmul.f32 %v703_v46, %v216_v17 }
 0x212   :  { %v108_v21 = vmul.f32 %v501_v13, %v107_v18  ;;  %345 = vperm.xlu0 %478, %v217_v19   ;;  %377 = vperm.xlu1 %479, %v217_v19  }
 0x213   :  { %330 = vperm.xlu2 %481, %v217_v19  }
 0x214   :  { %v109_v23 = vadd.f32 %v501_v13, %v108_v21 }
 0x216   :  { %v113_v25 = vsel %vm112_vm10, %v501_v13, %v109_v23 }
 0x217   :  { %v118_v26 = vsel %vm115_vm11, %v117_v24, %v113_v25 }
 0x218   :  { %v119_v27 = vmul.f32 %v706_v48, %v118_v26  ;;  %v395_v48 = vld [vmem:[%s796_s13 + $0x18] sm:$0xff] }
 0x219   :  { %415 = vmatpush.msra.mxu0 %v395_v48 }
 0x21a   :  { %480 = vset.pattern.permute.xlu1 %v504_v2  ;;  %485 = vset.pattern.permute.xlu0 %v503_v1 }
 0x21b   :  { %482 = vset.pattern.permute.xlu2 %v503_v1  ;;  %335 = vperm.xlu1 %480, %v119_v27  }
 0x21c   :  { %367 = vperm.xlu2 %482, %v119_v27   ;;  %416 = vmatpush.msra.mxu0 %v394_v49 }
 0x21e   :  { %417 = vmatpush.msra.mxu0 %v393_v50 }
 0x220   :  { %418 = vmatpush.msra.mxu0 %v392_v52 }
 0x223   :  { %483 = vset.pattern.permute.xlu1 %v506_v28 }
 0x224   :  { %484 = vset.pattern.permute.xlu2 %v505_v3  ;;  %361 = vperm.xlu1 %483, %v217_v19  }
 0x225   :  { %324 = vperm.xlu2 %484, %v119_v27  }
 0x26d   :  { %v331_v32 = vpop.permute.xlu2 %330 }
 0x26e   :  { %v333_v33 = vmul.f32 %v331_v32, %v251_v31 }
 0x276   :  { %v368_v37 = vpop.permute.xlu2 %367 }
 0x277   :  { %v370_v38 = vmul.f32 %v368_v37, %v320_v36 }
 0x279   :  { %372 = vrot.lane.b32.xlu2 %v370_v38, %s507_s28 }
 0x27f   :  { %v325_v61 = vpop.permute.xlu2 %324 }
 0x280   :  { %v327_v0 = vmul.f32 %v325_v61, %v154_v44 }
 0x284   :  { %v378_v39 = vpop.permute.xlu1 %377  ;;  %v346_v40 = vpop.permute.xlu0 %345 }
 0x285   :  { %v348_v41 = vmul.f32 %v346_v40, %v251_v31  ;;  %v380_v45 = vmul.f32 %v378_v39, %v320_v36 }
 0x287   :  { %350 = vrot.lane.b32.xlu1 %v348_v41, %s507_s28 }
 0x28d   :  { %v336_v46 = vpop.permute.xlu1 %335 }
 0x28e   :  { %v338_v47 = vmul.f32 %v336_v46, %v154_v44 }
 0x28f   :  { %382 = vrot.lane.b32.xlu1 %v380_v45, %s507_s28 }
 0x290   :  { %340 = vrot.lane.b32.xlu0 %v338_v47, %s507_s28 }
 0x296   :  { %v362_v51 = vpop.permute.xlu1 %361 }
 0x297   :  { %355 = vperm.xlu1 %483, %v119_v27   ;;  %v364_v55 = vmul.f32 %v362_v51, %v320_v36 }
 0x2d3   :  { %v373_v4 = vpop.permute.xlu2 %372 }
 0x2f9   :  { %v351_v53 = vpop.permute.xlu1 %350 }
 0x2fa   :  { %v353_v54 = vadd.f32 %v351_v53, %v333_v33 }
 0x2fc   :  { %v365_v56 = vadd.f32 %v364_v55, %v353_v54 }
 0x301   :  { %v383_v57 = vpop.permute.xlu1 %382 }
 0x302   :  { %v385_v58 = vadd.f32 %v383_v57, %v365_v56  ;;  %v341_v63 = vpop.permute.xlu0 %340 }
 0x303   :  { %v343_v2 = vadd.f32 %v341_v63, %v327_v0 }
 0x304   :  { %387 = vrot.lane.b32.xlu0 %v385_v58, %s508_s20 }
 0x309   :  { %v356_v62 = vpop.permute.xlu1 %355 }
 0x30a   :  { %v358_v1 = vmul.f32 %v356_v62, %v320_v36 }
 0x30c   :  { %v359_v3 = vadd.f32 %v358_v1, %v343_v2 }
 0x30e   :  { %v375_v5 = vadd.f32 %v373_v4, %v359_v3 }
 0x376   :  { %v388_v6 = vpop.permute.xlu0 %387 }
 0x377   :  { %v391_v7 = vsel %vm390_vm12, %v375_v5, %v388_v6 }
 0x378   :  { %469 = vmatmul.msk.f32.vlgmr.msra.gmra.mxu0 %vm65_vm0, %v391_v7 }
 0x3f5   :  { %v420_v11 = vpop.f32.mrf.mxu0 }
 0x3f6   :  { %v421_v12 = vadd.f32 %v492_v10, %v420_v11 }
 0x3f8   :  { %v423_v13 = vmax.f32 %v421_v12, 0.0 }
 0x3fa   :  { %470 = vmatmul.msk.f32.vlgmr.msrb.gmra.mxu1 %vm65_vm0, %v423_v13 }
 0x477   :  { %v452_v15 = vpop.f32.mrf.mxu1 }
 0x478   :  { %v453_v16 = vadd.f32 %v493_v14, %v452_v15 }
 0x47a   :  { %456 = vst.msk [vmem:[%s800_s17] sm:$0xff] %vm455_vm13, %v453_v16 }

</bundles_post_ra>
